<compile_context>
chip_gen: v7x
topology: tpu7x:2x2x1
jax: 0.10.0
libtpu: 0.0.40
codegen_flags: <defaults>
</compile_context>

<pallas_src>
import jax
import jax.numpy as jnp
from jax.experimental import pallas as pl
from jax.experimental.pallas import tpu as pltpu

HIDDEN = 256


def _round_up(n: int, m: int) -> int:
    return ((n + m - 1) // m) * m


def tiny_sdf_mlp_kernel(x_ref, w1t_ref, b1_ref, w2t_ref, b2_ref, o_ref):
    # x_ref:   (TB, in_dim)   bf16
    # w1t_ref: (in_dim, 256)  bf16     b1_ref: (1, 256)     f32
    # w2t_ref: (256, out_dim) bf16     b2_ref: (1, out_dim) f32
    # o_ref:   (TB, out_dim)  f32
    # fc1: MXU matmul (bf16 inputs, f32 accumulate); bias + ReLU in f32 on VPU.
    h = jnp.dot(x_ref[...], w1t_ref[...], preferred_element_type=jnp.float32)
    h = jnp.maximum(h + b1_ref[...], 0.0)
    # sdf_linear.batch_forward == plain linear: cast h to bf16 only for the MXU.
    out = jnp.dot(h.astype(w2t_ref.dtype), w2t_ref[...],
                  preferred_element_type=jnp.float32)
    o_ref[...] = (out + b2_ref[...]).astype(o_ref.dtype)


def tiny_sdf_mlp(x, w1, b1, w2, b2, *, tb: int = 2048):
    """x: [B, in_dim]; w1: [256, in_dim]; b1: [256]; w2: [out_dim, 256]; b2: [out_dim].

    tb: batch tile size (rows per grid step). Sweep 1024-8192; keep the
    (tb, 256) f32 hidden activation inside the per-chip VMEM budget
    (v7x scoped default ~32 MiB -> tb <= ~8192 is safe with margin).
    """
    B, in_dim = x.shape
    out_dim = w2.shape[0]
    out_dtype = x.dtype

    # ---- batch tiling: TB multiple of 8 sublanes, pad B up to a tile multiple ----
    tb = max(8, _round_up(tb, 8))
    TB = min(tb, _round_up(B, 8))
    Bp = _round_up(B, TB)
    if Bp != B:
        x = jnp.pad(x, ((0, Bp - B), (0, 0)))
    grid = (Bp // TB,)

    # ---- wrapper-side layout / dtype prep ----
    # Weights pre-transposed so both matmuls are plain (M,K)x(K,N) MXU ops.
    x_bf = x.astype(jnp.bfloat16)
    w1t = w1.T.astype(jnp.bfloat16)                    # (in_dim, 256)
    w2t = w2.T.astype(jnp.bfloat16)                    # (256, out_dim)
    b1r = b1.astype(jnp.float32).reshape(1, HIDDEN)
    b2r = b2.astype(jnp.float32).reshape(1, out_dim)

    # Advisory cost estimate so XLA can schedule/overlap around the call.
    flops = 2 * Bp * (in_dim * HIDDEN + HIDDEN * out_dim)
    bytes_accessed = (
        Bp * in_dim * 2                                   # bf16 x read
        + Bp * out_dim * jnp.dtype(out_dtype).itemsize    # out write
        + (in_dim * HIDDEN + HIDDEN * out_dim) * 2        # bf16 weights
        + (HIDDEN + out_dim) * 4                          # f32 biases
    )
    cost = pl.CostEstimate(flops=flops, transcendentals=0,
                           bytes_accessed=bytes_accessed)

    out = pl.pallas_call(
        tiny_sdf_mlp_kernel,
        out_shape=jax.ShapeDtypeStruct((Bp, out_dim), out_dtype),
        grid_spec=pltpu.PrefetchScalarGridSpec(
            num_scalar_prefetch=0,
            grid=grid,
            in_specs=[
                pl.BlockSpec((TB, in_dim), lambda i: (i, 0)),       # x tile (pipelined)
                pl.BlockSpec((in_dim, HIDDEN), lambda i: (0, 0)),   # W1^T (VMEM-resident)
                pl.BlockSpec((1, HIDDEN), lambda i: (0, 0)),        # b1   (resident)
                pl.BlockSpec((HIDDEN, out_dim), lambda i: (0, 0)),  # W2^T (resident)
                pl.BlockSpec((1, out_dim), lambda i: (0, 0)),       # b2   (resident)
            ],
            out_specs=pl.BlockSpec((TB, out_dim), lambda i: (i, 0)),
        ),
        compiler_params=pltpu.CompilerParams(
            # batch axis is embarrassingly parallel -> megacore sharding on v7x
            dimension_semantics=("parallel",)),
        cost_estimate=cost,
    )(x_bf, w1t, b1r, w2t, b2r)

    return out[:B] if Bp != B else out


def _init_linear(key, out_features, in_features, dtype=jnp.float32):
    """Deterministic init mimicking nn.Linear defaults (U(-1/sqrt(fan_in), +))."""
    kw, kb = jax.random.split(key)
    bound = 1.0 / (in_features ** 0.5)
    w = jax.random.uniform(kw, (out_features, in_features), dtype,
                           minval=-bound, maxval=bound)
    b = jax.random.uniform(kb, (out_features,), dtype,
                           minval=-bound, maxval=bound)
    return w, b


def _reference(x, w1, b1, w2, b2):
    """Pure-JAX reference emulating the kernel's bf16 input/weight casts."""
    xb = x.astype(jnp.bfloat16).astype(jnp.float32)
    w1b = w1.astype(jnp.bfloat16).astype(jnp.float32)
    w2b = w2.astype(jnp.bfloat16).astype(jnp.float32)
    h = jnp.maximum(xb @ w1b.T + b1, 0.0)
    hb = h.astype(jnp.bfloat16).astype(jnp.float32)
    return hb @ w2b.T + b2


if __name__ == "__main__":
    key = jax.random.PRNGKey(0)
    k_x, k_fc1, k_sdf, k_x2 = jax.random.split(key, 4)

    in_dim, out_dim = 16, 4
    w1, b1 = _init_linear(k_fc1, HIDDEN, in_dim)      # fc1: Linear(in_dim, 256)
    w2, b2 = _init_linear(k_sdf, out_dim, HIDDEN)     # sdf_linear: MyLinear(256, out_dim)

    # --- check 1: small batch, single grid step ---
    B1 = 8
    x1 = jax.random.normal(k_x, (B1, in_dim), jnp.float32)
    out1 = jax.block_until_ready(tiny_sdf_mlp(x1, w1, b1, w2, b2))
    ref1 = _reference(x1, w1, b1, w2, b2)
    assert out1.shape == (B1, out_dim)
    assert jnp.allclose(out1, ref1, atol=2e-2, rtol=2e-2), "mismatch vs reference (B=8)"

    # --- check 2: batch not divisible by tile -> padding + multi-step grid ---
    B2 = 20
    x2 = jax.random.normal(k_x2, (B2, in_dim), jnp.float32)
    out2 = jax.block_until_ready(tiny_sdf_mlp(x2, w1, b1, w2, b2, tb=16))
    ref2 = _reference(x2, w1, b1, w2, b2)
    assert out2.shape == (B2, out_dim)
    assert jnp.allclose(out2, ref2, atol=2e-2, rtol=2e-2), "mismatch vs reference (B=20)"

    print("KERNEL_OK")
</pallas_src>

<mosaic_0001>
module attributes {stable_mosaic.version = 11 : i64} {
  func.func @tiny_sdf_mlp_kernel(%arg0: i32, %arg1: memref<8x16xbf16, #tpu.memory_space<vmem>>, %arg2: memref<16x256xbf16, #tpu.memory_space<vmem>>, %arg3: memref<1x256xf32, #tpu.memory_space<vmem>>, %arg4: memref<256x4xbf16, #tpu.memory_space<vmem>>, %arg5: memref<1x4xf32, #tpu.memory_space<vmem>>, %arg6: memref<8x4xf32, #tpu.memory_space<vmem>>) attributes {dimension_semantics = [#tpu.dimension_semantics<parallel>], iteration_bounds = array<i64: 1>, scalar_prefetch = 0 : i64, scratch_operands = 0 : i64, tpu.core_type = #tpu.core_type<tc>, window_params = [{transform_indices = @transform_0, window_bounds = array<i64: 8, 16>}, {pipeline_mode = #tpu.pipeline_mode<synchronous>, transform_indices = @transform_1, window_bounds = array<i64: 16, 256>}, {pipeline_mode = #tpu.pipeline_mode<synchronous>, transform_indices = @transform_2, window_bounds = array<i64: 1, 256>}, {pipeline_mode = #tpu.pipeline_mode<synchronous>, transform_indices = @transform_3, window_bounds = array<i64: 256, 4>}, {pipeline_mode = #tpu.pipeline_mode<synchronous>, transform_indices = @transform_4, window_bounds = array<i64: 1, 4>}, {transform_indices = @transform_5, window_bounds = array<i64: 8, 4>}]} {
    %c0 = arith.constant 0 : index
    %c0_0 = arith.constant 0 : index
    %0 = vector.load %arg1[%c0, %c0_0] : memref<8x16xbf16, #tpu.memory_space<vmem>>, vector<8x16xbf16>
    %c0_1 = arith.constant 0 : index
    %c0_2 = arith.constant 0 : index
    %1 = vector.load %arg2[%c0_1, %c0_2] : memref<16x256xbf16, #tpu.memory_space<vmem>>, vector<16x256xbf16>
    %cst = arith.constant dense<0.000000e+00> : vector<8x256xf32>
    %2 = tpu.matmul %0, %1, %cst {dimension_numbers = #tpu.dot_dimension_numbers<[1], [0], [0], [1], [0, 0, 1, 1], [], []>} : vector<8x16xbf16>, vector<16x256xbf16>, vector<8x256xf32> -> vector<8x256xf32>
    %c0_3 = arith.constant 0 : index
    %c0_4 = arith.constant 0 : index
    %3 = vector.load %arg3[%c0_3, %c0_4] : memref<1x256xf32, #tpu.memory_space<vmem>>, vector<1x256xf32>
    %4 = vector.broadcast %3 : vector<1x256xf32> to vector<8x256xf32>
    %5 = arith.addf %2, %4 : vector<8x256xf32>
    %cst_5 = arith.constant 0.000000e+00 : f32
    %6 = vector.broadcast %cst_5 : f32 to vector<8x256xf32>
    %7 = arith.maximumf %5, %6 : vector<8x256xf32>
    %8 = arith.truncf %7 : vector<8x256xf32> to vector<8x256xbf16>
    %c0_6 = arith.constant 0 : index
    %c0_7 = arith.constant 0 : index
    %9 = vector.load %arg4[%c0_6, %c0_7] : memref<256x4xbf16, #tpu.memory_space<vmem>>, vector<256x4xbf16>
    %cst_8 = arith.constant dense<0.000000e+00> : vector<8x4xf32>
    %10 = tpu.matmul %8, %9, %cst_8 {dimension_numbers = #tpu.dot_dimension_numbers<[1], [0], [0], [1], [0, 0, 1, 1], [], []>} : vector<8x256xbf16>, vector<256x4xbf16>, vector<8x4xf32> -> vector<8x4xf32>
    %c0_9 = arith.constant 0 : index
    %c0_10 = arith.constant 0 : index
    %11 = vector.load %arg5[%c0_9, %c0_10] : memref<1x4xf32, #tpu.memory_space<vmem>>, vector<1x4xf32>
    %12 = vector.broadcast %11 : vector<1x4xf32> to vector<8x4xf32>
    %13 = arith.addf %10, %12 : vector<8x4xf32>
    %c0_11 = arith.constant 0 : index
    %c0_12 = arith.constant 0 : index
    %14 = vector.load %arg6[%c0_11, %c0_12] : memref<8x4xf32, #tpu.memory_space<vmem>>, vector<8x4xf32>
    tpu.vector_store %arg6[%c0_11, %c0_12], %13 {strides = array<i32>} : memref<8x4xf32, #tpu.memory_space<vmem>>, vector<8x4xf32>,
    return
  }
  func.func @transform_0(%arg0: i32) -> (i32, i32) {
    %c0_i32 = arith.constant 0 : i32
    %c0_i32_0 = arith.constant 0 : i32
    return %arg0, %c0_i32 : i32, i32
  }
  func.func @transform_1(%arg0: i32) -> (i32, i32) {
    %c0_i32 = arith.constant 0 : i32
    %c0_i32_0 = arith.constant 0 : i32
    %c0_i32_1 = arith.constant 0 : i32
    return %c0_i32, %c0_i32_0 : i32, i32
  }
  func.func @transform_2(%arg0: i32) -> (i32, i32) {
    %c0_i32 = arith.constant 0 : i32
    %c0_i32_0 = arith.constant 0 : i32
    %c0_i32_1 = arith.constant 0 : i32
    return %c0_i32, %c0_i32_0 : i32, i32
  }
  func.func @transform_3(%arg0: i32) -> (i32, i32) {
    %c0_i32 = arith.constant 0 : i32
    %c0_i32_0 = arith.constant 0 : i32
    %c0_i32_1 = arith.constant 0 : i32
    return %c0_i32, %c0_i32_0 : i32, i32
  }
  func.func @transform_4(%arg0: i32) -> (i32, i32) {
    %c0_i32 = arith.constant 0 : i32
    %c0_i32_0 = arith.constant 0 : i32
    %c0_i32_1 = arith.constant 0 : i32
    return %c0_i32, %c0_i32_0 : i32, i32
  }
  func.func @transform_5(%arg0: i32) -> (i32, i32) {
    %c0_i32 = arith.constant 0 : i32
    %c0_i32_0 = arith.constant 0 : i32
    return %arg0, %c0_i32 : i32, i32
  }
}

</mosaic_0001>

<bundles_post_ra>
// kernel: tpu_custom_call.1
= control target key start
LH: loop header
LB: loop body
LE: loop exit
PB: predicated region body
PF: predicated region fallthrough
CT: control target
= control target key end

     0   :  { %v338_v1 = vmov 0   ;;  %vm46_vm0 = vcmask 130048   ;;  %v26_v20 = vlaneseq  ;;  %vm270_vm1 = vcmask 31744   ;;  %s435_s1 = inlined_call_operand.vmem [shape: bf16[16,256], index: 1, kind: input, shape index: {}]   ;;  %s436_s0 = inlined_call_operand.vmem [shape: bf16[8,16], index: 0, kind: input, shape index: {}]   ;;  %s437_s3 = inlined_call_operand.vmem [shape: bf16[256,4], index: 3, kind: input, shape index: {}]   ;;  %s438_s2 = inlined_call_operand.vmem [shape: f32[1,256], index: 2, kind: input, shape index: {}]   ;;  %s439_s4 = inlined_call_operand.vmem [shape: f32[1,4], index: 4, kind: input, shape index: {}]   ;;  %s440_s5 = inlined_call_operand.vmem [shape: f32[8,4], index: 5, kind: output, shape index: {}]  }
   0x1   :  { %v319_v0 = vld [vmem:[%s435_s1 + $0x4] ss:$8 sps:$4 sm:$0xff]   ;;  %82 = vmatprep.mubr.bf16.mxu0 %v338_v1  ;;  %v321_v2 = vld [vmem:[%s435_s1] ss:$8 sps:$4 sm:$0xff]   ;;  %v326_v8 = vld [vmem:[%s437_s3 + $0x50] sm:$0xff]  }
   0x2   :  { %v21_v3 = vld [vmem:[%s436_s0] sm:$0xf]  ;;  %50 = vmatprep.subr.bf16.mxu0 %v319_v0  ;;  %v324_v6 = vld [vmem:[%s437_s3 + $0x48] sm:$0xff]   ;;  %v327_v9 = vld [vmem:[%s437_s3 + $0x10] sm:$0xff]   ;;  %v27_v21 = vshrl.u32 %v26_v20, 7 }
   0x3   :  { %v322_v4 = vld [vmem:[%s437_s3 + $0x40] sm:$0xff]   ;;  %51 = vmatpush1.bf16.msra.mxu0 %v321_v2  ;;  %v325_v7 = vld [vmem:[%s437_s3 + $0x8] sm:$0xff]   ;;  %v328_v10 = vld [vmem:[%s437_s3 + $0x58] sm:$0xff]  }
   0x4   :  { %v323_v5 = vld [vmem:[%s437_s3] sm:$0xff]   ;;  %296 = vmatprep.subr.bf16.mxu1 %v322_v4  ;;  %v329_v11 = vld [vmem:[%s437_s3 + $0x18] sm:$0xff]   ;;  %v332_v14 = vld [vmem:[%s437_s3 + $0x68] sm:$0xff]   ;;  %v28_v22 = vsub.s32 0, %v27_v21  ;;  %v32_v24 = vsub.s32 1, %v27_v21 }
   0x5   :  { %297 = vmatpush3.bf16.msra.mxu1 %v323_v5  ;;  %v330_v12 = vld [vmem:[%s437_s3 + $0x60] sm:$0xff]   ;;  %v333_v15 = vld [vmem:[%s437_s3 + $0x28] sm:$0xff]   ;;  %v334_v16 = vld [vmem:[%s437_s3 + $0x70] sm:$0xff]  }
   0x6   :  { %278 = vmatmul.mubr.msk.bf16.vlgmr.msra.gmra.mrb[0].mxu0 %vm46_vm0, %v21_v3  ;;  %298 = vmatprep.subr.bf16.mxu1 %v324_v6  ;;  %v331_v13 = vld [vmem:[%s437_s3 + $0x20] sm:$0xff]   ;;  %v335_v17 = vld [vmem:[%s437_s3 + $0x30] sm:$0xff]   ;;  %v336_v18 = vld [vmem:[%s437_s3 + $0x78] sm:$0xff]  }
   0x7   :  { %v337_v19 = vld [vmem:[%s437_s3 + $0x38] sm:$0xff]   ;;  %v24_v23 = vld [vmem:[%s438_s2] sm:$0x3] }
   0x8   :  { %v29_v25 = vrot.slane %v24_v23, %v28_v22  ;;  %v33_v26 = vrot.slane %v24_v23, %v32_v24  ;;  %v279_v38 = vld [vmem:[%s439_s4] ss:$0 sm:$0xff] }
   0x9   :  { %299 = vmatpush3.bf16.msra.mxu1 %v325_v7 }
   0xa   :  { %300 = vmatprep.subr.bf16.mxu1 %v326_v8 }
   0xd   :  { %301 = vmatpush3.bf16.msra.mxu1 %v327_v9 }
   0xe   :  { %302 = vmatprep.subr.bf16.mxu1 %v328_v10 }
  0x11   :  { %303 = vmatpush3.bf16.msra.mxu1 %v329_v11 }
  0x12   :  { %304 = vmatprep.subr.bf16.mxu1 %v330_v12 }
  0x15   :  { %305 = vmatpush3.bf16.msra.mxu1 %v331_v13 }
  0x16   :  { %306 = vmatprep.subr.bf16.mxu1 %v332_v14 }
  0x19   :  { %307 = vmatpush3.bf16.msra.mxu1 %v333_v15 }
  0x1a   :  { %308 = vmatprep.subr.bf16.mxu1 %v334_v16 }
  0x1d   :  { %309 = vmatpush3.bf16.msra.mxu1 %v335_v17 }
  0x1e   :  { %310 = vmatprep.subr.bf16.mxu1 %v336_v18 }
  0x21   :  { %311 = vmatpush3.bf16.msra.mxu1 %v337_v19 }
  0xd9   :  { %v84_v27 = vpop.f32.mrb[0].mxu0 }
  0xda   :  { %v85_v28 = vadd.f32 %v84_v27, %v29_v25  ;;  %v86_v29 = vpop.f32.mrb[1].mxu0 }
  0xdb   :  { %v87_v30 = vadd.f32 %v86_v29, %v33_v26  ;;  %v88_v31 = vpop.f32.mrb[2].mxu0 }
  0xdc   :  { %v91_v32 = vmax.f32 %v85_v28, 0.0  ;;  %v89_v33 = vpop.f32.mrb[3].mxu0 }
  0xdd   :  { %v92_v34 = vmax.f32 %v87_v30, 0.0 }
  0xde   :  { %v93_v36 = vpack.c.bf16 %v91_v32, %v91_v32 }
  0xdf   :  { %v94_v35 = vpack.c.bf16 %v92_v34, %v92_v34 }
  0xe1   :  { %262 = vmatprep.mubr.bf16.mxu1 %v94_v35 }
  0xe2   :  { %263 = vmatmul.mubr.bf16.vlgmr.msra.gmra.mrb[0].mxu1 %v93_v36 }
 0x1b5   :  { %v312_v37 = vpop.f32.mrb[0].mxu1 }
 0x1b6   :  { %v313_v39 = vpop.f32.mrb[1].mxu1 }
 0x1b7   :  { %v314_v40 = vadd.f32 %v313_v39, %v312_v37  ;;  %v315_v41 = vpop.f32.mrb[2].mxu1 }
 0x1b8   :  { %v316_v42 = vpop.f32.mrb[3].mxu1 }
 0x1b9   :  { %v265_v43 = vadd.f32 %v314_v40, %v279_v38 }
 0x1bb   :  { %271 = vst.msk [vmem:[%s440_s5] sm:$0xff] %vm270_vm1, %v265_v43 }

</bundles_post_ra>
